<compile_context>
chip_gen: v5e
topology: v5e:2x2
jax: 0.10.0
libtpu: 0.0.40
codegen_flags: <defaults>
</compile_context>

<pallas_src>
import functools

import jax
import jax.numpy as jnp
from jax.experimental import pallas as pl
from jax.experimental.pallas import tpu as pltpu


def _sublane_multiple(dtype) -> int:
    """Minimum sublane-tile multiple for a sliced block dim of this dtype."""
    return {4: 8, 2: 16, 1: 32}.get(jnp.dtype(dtype).itemsize, 8)


def _bn_stats_kernel(x_ref, sum_ref, sumsq_ref):
    """Per-channel sum / sum-of-squares, accumulated across the batch grid axis."""
    n = pl.program_id(0)
    xf = x_ref[...].astype(jnp.float32)                  # (Cb, HW) block for one sample
    s = jnp.sum(xf, axis=-1, keepdims=True)              # (Cb, 1)
    q = jnp.sum(xf * xf, axis=-1, keepdims=True)         # (Cb, 1)

    @pl.when(n == 0)
    def _():
        sum_ref[...] = s
        sumsq_ref[...] = q

    @pl.when(n != 0)
    def _():
        sum_ref[...] += s
        sumsq_ref[...] += q


def _ibn_norm_kernel(x_ref, in_w_ref, in_b_ref, bn_scale_ref, bn_shift_ref,
                     o_ref, *, half1, inv_hw, eps):
    """One sample per grid step: IN on channels [0, half1), folded BN affine on the rest."""
    c_total = x_ref.shape[0]

    # ---- InstanceNorm half: per-(sample, channel) stats over HW, single-pass sum/sumsq.
    x1 = x_ref[0:half1, :].astype(jnp.float32)           # (half1, HW)
    s1 = jnp.sum(x1, axis=-1, keepdims=True)
    q1 = jnp.sum(x1 * x1, axis=-1, keepdims=True)
    mu1 = s1 * inv_hw
    var1 = jnp.maximum(q1 * inv_hw - mu1 * mu1, 0.0)      # biased variance
    scale1 = in_w_ref[...] * jax.lax.rsqrt(var1 + eps)
    shift1 = in_b_ref[...] - mu1 * scale1
    o_ref[0:half1, :] = (x1 * scale1 + shift1).astype(o_ref.dtype)

    # ---- BatchNorm half: apply precomputed per-channel scale/shift.
    x2 = x_ref[half1:c_total, :].astype(jnp.float32)      # (half2, HW)
    o_ref[half1:c_total, :] = (x2 * bn_scale_ref[...] + bn_shift_ref[...]).astype(o_ref.dtype)


def ibn_forward(x_nchw, in_w, in_b, bn_w, bn_b, *, eps=1e-5):
    """IBN forward. x_nchw: (N, C, H, W). Params: IN weight/bias (half1,), BN weight/bias (C-half1,)."""
    N, C, H, W = x_nchw.shape
    HW = H * W
    half1 = int(in_w.shape[0])
    half2 = C - half1
    assert half1 >= 1 and half2 >= 1 and bn_w.shape[0] == half2

    itemsize = jnp.dtype(x_nchw.dtype).itemsize
    x3 = x_nchw.reshape(N, C, HW)

    # ---------------- Pass 1: BN batch statistics (sum / sumsq per channel) ----------------
    sub = _sublane_multiple(x_nchw.dtype)
    if (half1 % half2 == 0) and (half2 % sub == 0):
        cb, c_blk = half2, half1 // half2        # tile-aligned split: read only the BN half
    else:
        cb, c_blk = C, 0                         # unaligned split: read full C, slice stats later

    vmem_p1 = int(min(max(4 * cb * HW * max(itemsize, 4), 32 << 20), 96 << 20))
    bn_sum, bn_sumsq = pl.pallas_call(
        _bn_stats_kernel,
        grid=(N,),
        in_specs=[pl.BlockSpec((None, cb, HW), lambda n: (n, c_blk, 0))],
        out_specs=(pl.BlockSpec((cb, 1), lambda n: (0, 0)),
                   pl.BlockSpec((cb, 1), lambda n: (0, 0))),
        out_shape=(jax.ShapeDtypeStruct((cb, 1), jnp.float32),
                   jax.ShapeDtypeStruct((cb, 1), jnp.float32)),
        compiler_params=pltpu.CompilerParams(
            dimension_semantics=("arbitrary",),   # accumulator output stays resident across N
            vmem_limit_bytes=vmem_p1),
        cost_estimate=pl.CostEstimate(
            flops=3 * N * cb * HW, transcendentals=0,
            bytes_accessed=N * cb * HW * itemsize + 2 * cb * 4),
    )(x3)
    if cb != half2:
        bn_sum, bn_sumsq = bn_sum[half1:], bn_sumsq[half1:]

    # Fold batch stats + affine into per-channel scale/shift (tiny; done by XLA).
    cnt = float(N * HW)
    bn_mean = bn_sum / cnt
    bn_var = jnp.maximum(bn_sumsq / cnt - bn_mean * bn_mean, 0.0)   # biased variance
    bn_scale = bn_w.reshape(half2, 1).astype(jnp.float32) * jax.lax.rsqrt(bn_var + eps)
    bn_shift = bn_b.reshape(half2, 1).astype(jnp.float32) - bn_mean * bn_scale

    # ---------------- Pass 2: normalize both halves, one sample per grid step ---------------
    vmem_p2 = int(min(max(4 * C * HW * itemsize + 4 * C * HW * 4, 32 << 20), 96 << 20))
    kernel = functools.partial(_ibn_norm_kernel, half1=half1, inv_hw=1.0 / HW, eps=eps)
    out3 = pl.pallas_call(
        kernel,
        grid=(N,),
        in_specs=[
            pl.BlockSpec((None, C, HW), lambda n: (n, 0, 0)),
            pl.BlockSpec((half1, 1), lambda n: (0, 0)),
            pl.BlockSpec((half1, 1), lambda n: (0, 0)),
            pl.BlockSpec((half2, 1), lambda n: (0, 0)),
            pl.BlockSpec((half2, 1), lambda n: (0, 0)),
        ],
        out_specs=pl.BlockSpec((None, C, HW), lambda n: (n, 0, 0)),
        out_shape=jax.ShapeDtypeStruct((N, C, HW), x_nchw.dtype),
        compiler_params=pltpu.CompilerParams(
            dimension_semantics=("parallel",),    # independent samples -> megacore-shardable
            vmem_limit_bytes=vmem_p2),
        cost_estimate=pl.CostEstimate(
            flops=7 * N * C * HW, transcendentals=N * half1,
            bytes_accessed=2 * N * C * HW * itemsize),
    )(x3,
      in_w.reshape(half1, 1).astype(jnp.float32),
      in_b.reshape(half1, 1).astype(jnp.float32),
      bn_scale, bn_shift)

    return out3.reshape(N, C, H, W)


def ibn_reference(x, in_w, in_b, bn_w, bn_b, *, eps=1e-5):
    """Pure-JAX reference of the PyTorch IBN forward (training mode)."""
    half1 = in_w.shape[0]
    x1 = x[:, :half1]
    x2 = x[:, half1:]
    # InstanceNorm2d
    mu1 = jnp.mean(x1, axis=(2, 3), keepdims=True)
    var1 = jnp.var(x1, axis=(2, 3), keepdims=True)
    y1 = (x1 - mu1) / jnp.sqrt(var1 + eps)
    y1 = y1 * in_w[None, :, None, None] + in_b[None, :, None, None]
    # BatchNorm2d (batch stats, biased var)
    mu2 = jnp.mean(x2, axis=(0, 2, 3), keepdims=True)
    var2 = jnp.var(x2, axis=(0, 2, 3), keepdims=True)
    y2 = (x2 - mu2) / jnp.sqrt(var2 + eps)
    y2 = y2 * bn_w[None, :, None, None] + bn_b[None, :, None, None]
    return jnp.concatenate([y1, y2], axis=1)


if __name__ == "__main__":
    # Small shapes consistent with the module: planes=4 -> half1=2, half2=2
    N, C, H, W = 2, 4, 16, 16
    half1 = C // 2
    half2 = C - half1

    key = jax.random.PRNGKey(0)
    x = jax.random.normal(key, (N, C, H, W), dtype=jnp.float32)

    # PyTorch default init: InstanceNorm2d(affine=True) / BatchNorm2d -> weight=1, bias=0
    in_w = jnp.ones((half1,), jnp.float32)
    in_b = jnp.zeros((half1,), jnp.float32)
    bn_w = jnp.ones((half2,), jnp.float32)
    bn_b = jnp.zeros((half2,), jnp.float32)

    out = ibn_forward(x, in_w, in_b, bn_w, bn_b)
    out = jax.block_until_ready(out)

    ref = ibn_reference(x, in_w, in_b, bn_w, bn_b)
    assert out.shape == (N, C, H, W)
    assert jnp.allclose(out, ref, atol=1e-4, rtol=1e-4), "mismatch vs reference"

    print("KERNEL_OK")
</pallas_src>

<mosaic_0001>
module attributes {stable_mosaic.version = 11 : i64} {
  func.func @_bn_stats_kernel(%arg0: i32, %arg1: memref<1x4x256xf32, #tpu.memory_space<vmem>>, %arg2: memref<4x1xf32, #tpu.memory_space<vmem>>, %arg3: memref<4x1xf32, #tpu.memory_space<vmem>>) attributes {dimension_semantics = [#tpu.dimension_semantics<arbitrary>], iteration_bounds = array<i64: 2>, scalar_prefetch = 0 : i64, scratch_operands = 0 : i64, tpu.core_type = #tpu.core_type<tc>, window_params = [{transform_indices = @transform_0, window_bounds = array<i64: 1, 4, 256>}, {pipeline_mode = #tpu.pipeline_mode<synchronous>, transform_indices = @transform_1, window_bounds = array<i64: 4, 1>}, {pipeline_mode = #tpu.pipeline_mode<synchronous>, transform_indices = @transform_2, window_bounds = array<i64: 4, 1>}]} {
    %c0 = arith.constant 0 : index
    %c0_0 = arith.constant 0 : index
    %c0_1 = arith.constant 0 : index
    %0 = vector.load %arg1[%c0, %c0_0, %c0_1] : memref<1x4x256xf32, #tpu.memory_space<vmem>>, vector<1x4x256xf32>
    %1 = vector.shape_cast %0 : vector<1x4x256xf32> to vector<4x256xf32>
    %cst = arith.constant dense<0.000000e+00> : vector<4xf32>
    %2 = vector.multi_reduction <add>, %1, %cst [1] : vector<4x256xf32> to vector<4xf32>
    %3 = vector.shape_cast %2 : vector<4xf32> to vector<4x1xf32>
    %4 = arith.mulf %1, %1 : vector<4x256xf32>
    %cst_2 = arith.constant dense<0.000000e+00> : vector<4xf32>
    %5 = vector.multi_reduction <add>, %4, %cst_2 [1] : vector<4x256xf32> to vector<4xf32>
    %6 = vector.shape_cast %5 : vector<4xf32> to vector<4x1xf32>
    %c0_i32 = arith.constant 0 : i32
    %7 = arith.cmpi eq, %arg0, %c0_i32 : i32
    %8 = arith.extui %7 : i1 to i32
    %c0_i32_3 = arith.constant 0 : i32
    %9 = arith.cmpi ne, %8, %c0_i32_3 : i32
    scf.if %9 {
      %c0_6 = arith.constant 0 : index
      %c0_7 = arith.constant 0 : index
      %13 = vector.load %arg2[%c0_6, %c0_7] : memref<4x1xf32, #tpu.memory_space<vmem>>, vector<4x1xf32>
      tpu.vector_store %arg2[%c0_6, %c0_7], %3 {strides = array<i32>} : memref<4x1xf32, #tpu.memory_space<vmem>>, vector<4x1xf32>,
      %c0_8 = arith.constant 0 : index
      %c0_9 = arith.constant 0 : index
      %14 = vector.load %arg3[%c0_8, %c0_9] : memref<4x1xf32, #tpu.memory_space<vmem>>, vector<4x1xf32>
      tpu.vector_store %arg3[%c0_8, %c0_9], %6 {strides = array<i32>} : memref<4x1xf32, #tpu.memory_space<vmem>>, vector<4x1xf32>,
    } else {
    }
    %c0_i32_4 = arith.constant 0 : i32
    %10 = arith.cmpi ne, %arg0, %c0_i32_4 : i32
    %11 = arith.extui %10 : i1 to i32
    %c0_i32_5 = arith.constant 0 : i32
    %12 = arith.cmpi ne, %11, %c0_i32_5 : i32
    scf.if %12 {
      %c0_6 = arith.constant 0 : index
      %c0_7 = arith.constant 0 : index
      %13 = vector.load %arg2[%c0_6, %c0_7] : memref<4x1xf32, #tpu.memory_space<vmem>>, vector<4x1xf32>
      %14 = arith.addf %13, %3 : vector<4x1xf32>
      %c0_8 = arith.constant 0 : index
      %c0_9 = arith.constant 0 : index
      %15 = vector.load %arg2[%c0_8, %c0_9] : memref<4x1xf32, #tpu.memory_space<vmem>>, vector<4x1xf32>
      tpu.vector_store %arg2[%c0_8, %c0_9], %14 {strides = array<i32>} : memref<4x1xf32, #tpu.memory_space<vmem>>, vector<4x1xf32>,
      %c0_10 = arith.constant 0 : index
      %c0_11 = arith.constant 0 : index
      %16 = vector.load %arg3[%c0_10, %c0_11] : memref<4x1xf32, #tpu.memory_space<vmem>>, vector<4x1xf32>
      %17 = arith.addf %16, %6 : vector<4x1xf32>
      %c0_12 = arith.constant 0 : index
      %c0_13 = arith.constant 0 : index
      %18 = vector.load %arg3[%c0_12, %c0_13] : memref<4x1xf32, #tpu.memory_space<vmem>>, vector<4x1xf32>
      tpu.vector_store %arg3[%c0_12, %c0_13], %17 {strides = array<i32>} : memref<4x1xf32, #tpu.memory_space<vmem>>, vector<4x1xf32>,
    } else {
    }
    return
  }
  func.func @transform_0(%arg0: i32) -> (i32, i32, i32) {
    %c0_i32 = arith.constant 0 : i32
    %c0_i32_0 = arith.constant 0 : i32
    %c0_i32_1 = arith.constant 0 : i32
    return %arg0, %c0_i32, %c0_i32_0 : i32, i32, i32
  }
  func.func @transform_1(%arg0: i32) -> (i32, i32) {
    %c0_i32 = arith.constant 0 : i32
    %c0_i32_0 = arith.constant 0 : i32
    %c0_i32_1 = arith.constant 0 : i32
    return %c0_i32, %c0_i32_0 : i32, i32
  }
  func.func @transform_2(%arg0: i32) -> (i32, i32) {
    %c0_i32 = arith.constant 0 : i32
    %c0_i32_0 = arith.constant 0 : i32
    %c0_i32_1 = arith.constant 0 : i32
    return %c0_i32, %c0_i32_0 : i32, i32
  }
}

</mosaic_0001>

<bundles_post_ra>
// kernel: tpu_custom_call.1
= control target key start
LH: loop header
LB: loop body
LE: loop exit
PB: predicated region body
PF: predicated region fallthrough
CT: control target
= control target key end

     0   :  { %8 = vsyncpa [#allocation3], 0  ;;  %s484_s0 = inlined_call_operand.hbm [shape: f32[2,4,256], index: 0, kind: input, shape index: {}]   ;;  %s485_s1 = inlined_call_operand.vmem [shape: f32[4,1], index: 1, kind: output, shape index: {0}]   ;;  %s486_s2 = inlined_call_operand.vmem [shape: f32[4,1], index: 2, kind: output, shape index: {1}]  }
   0x1   :  { %10 = vsyncpa [#allocation3 + $0x1], 0  ;;  %s368_s9 = smov 0   ;;  %s370_s10 = smov 0  }
   0x2   :  { %s372_s11 = smov 0   ;;  %s374_s12 = smov 0  }
   0x3 LB: > { %s235_s13 = sadd.s32 4294967295, %s351_s12   ;;  %s388_s14 = sadd.s32 1, %s351_s12   ;;  %s351_s12 = sphi %s374_s12, %s494_s12   ;;  %s347_s11 = sphi %s372_s11, %s493_s11   ;;  %s343_s10 = sphi %s370_s10, %s492_s10   ;;  %s339_s9 = sphi %s368_s9, %s491_s9  }
   0x4   : > { %s20_s15 = ssub.s32 %s351_s12, %s388_s14  ;;  %s23_s16 = sadd.s32 1, %s347_s11 }
   0x5   : > { %p21_p0 = scmp.eq.s32.totalorder %s20_s15, 0  ;;  %p30_p1 = scmp.ne.s32.totalorder %s347_s11, %s343_s10 }
   0x6   : > { %p31_p2 = scmp.eq.s32.totalorder %s351_s12, 0  ;;  %p36_p3 = scmp.ne.s32.totalorder %s343_s10, %s339_s9 }
   0x7   : > { %s398_s17 = scalar_select %p21_p0, %s347_s11, %s23_s16  }
   0x8   : > { %p400_p4 = por %p31_p2, %p30_p1  ;;  %p406_p5 = scmp.eq.s32.totalorder %s235_s13, 0 }
   0x9   : > { %p254_p6 = scmp.lt.s32.totalorder %s351_s12, 2  ;;  %s102_s21 = sand.u32 1, %s347_s11  }
   0xa   : > { %p413_p7 = por %p406_p5, %p36_p3  ;;  %s238_s22 = sshll.u32 %s102_s21, 3 }
   0xb   : > { %s247_s23 = sshll.u32 %s351_s12, 3  ;;  %s106_s27 = scalar_lea.vmem [#allocation2], %s238_s22 }
   0xc   : > { %s111_s26 = scalar_lea.hbm %s484_s0, %s247_s23  ;;  %s115_s28 = sshll.u32 %s106_s27, 4  ;;  %s116_s28 = int_to_ptr.vmem [resolvable:$true] %s115_s28 }
   0xd   : > { %s113_s29 = sshll.u32 %s111_s26, 4  ;;  %p424_p8 = pnand %p254_p6, %p400_p4  ;;  %s114_s29 = int_to_ptr.hbm [resolvable:$true] %s113_s29 }
   0xe   : > { %p241_p9 = scmp.ge.s32.totalorder %s351_s12, 1  ;;  %p120_p10 = scmp.lt.s32.totalorder %s351_s12, 3 }
   0xf   : > { %s103_s3 = scalar_lea.sflag [#allocation3], %s102_s21  ;;  %s287_s4 = sshra.s32 %s114_s29, 4  ;;  %s288_s4 = int_to_ptr.hbm [resolvable:$true] %s287_s4 }
  0x10   : > { %s289_s5 = scalar_lea.hbm %s288_s4, 8  ;;  %p291_p12 = pneg %p424_p8 }
  0x11   : > { %p290_p11 = scmp.ne.s32.totalorder %s288_s4, %s289_s5  ;;  %s294_s8 = scalar_lea.hbm %s484_s0, 16 }
  0x12   : > { %p295_p1 = scmp.lt.s32.totalorder %s288_s4, %s484_s0  ;;  %p296_p2 = scmp.lt.s32.totalorder %s294_s8, %s289_s5 }
  0x13   : > { %p292_p13 = pnand %p291_p12, %p290_p11 }
  0x14   : > { %p297_p3 = por %p296_p2, %p295_p1 }
  0x15   : > { %p293_p0 = pneg %p292_p13 }
  0x17   : > { %p298_p4 = pnand %p297_p3, %p293_p0 }
  0x19   : > { %301 = shalt.err (!%p298_p4)
}
  0x1a   : > { %253 = dma.hbm_to_vmem [thread:$0]  (!%p424_p8), %s114_s29, 128, %s116_s28, %s103_s3  }
  0x1b   : > { %p121_p6 = pnand %p241_p9, %p120_p10 }
  0x1c   : > { %s126_s16 = sand.u32 (!%p121_p6), 1, %s343_s10  }
  0x1d   : > { %124 = sbr.rel (%p121_p6) target bundleno = 184 (0xb8), region = 24  ;;  %s242_s18 = sshll.u32 (!%p121_p6), %s126_s16, 3 }
  0x1e   : > { %s127_s21 = scalar_lea.sflag (!%p121_p6), [#allocation3], %s126_s16  ;;  %s130_s22 = scalar_lea.vmem (!%p121_p6), [#allocation2], %s242_s18 }
  0x22   : > { %334 = dma.done.wait (%p413_p7), %s127_s21, 128  }
  0x23   : > { %336 = vsyncadd (%p413_p7), %s127_s21, 4294967168  ;;  %v147_v0 = vld [vmem:[%s130_s22] sm:$0xff]  ;;  %vm154_vm0 = vcmask 1043456   ;;  %p243_p7 = scmp.ne.s32.totalorder %s235_s13, 0 }
  0x24   : > { %149 = vst [vmem:[#allocation1] ss:$2 sm:$0xff] %v147_v0  ;;  %v160_v1 = vmul.f32 %v147_v0, %v147_v0 }
  0x2b   : > { %v150_v2 = vld.sshfl [vmem:[#allocation1] sm:$0xff pattern:$0x75316420]  ;;  %v151_v3 = vld.sshfl [vmem:[#allocation1 + $0x8] sm:$0xff pattern:$0x75316420] }
  0x2c   : > { %v155_v4 = vsel %vm154_vm0, %v150_v2, 0.0  ;;  %v156_v5 = vsel %vm154_vm0, %v151_v3, 0.0  ;;  %162 = vst [vmem:[#allocation1] ss:$2 sm:$0xff] %v160_v1 }
  0x2d   : > { %v157_v6 = vadd.f32 %v156_v5, %v155_v4 }
  0x2f   : > { %158 = vadd.xlane.f32.xlu0 %v157_v6 }
  0x33   : > { %v163_v7 = vld.sshfl [vmem:[#allocation1] sm:$0xff pattern:$0x75316420]  ;;  %v164_v8 = vld.sshfl [vmem:[#allocation1 + $0x8] sm:$0xff pattern:$0x75316420] }
  0x34   : > { %v167_v9 = vsel %vm154_vm0, %v163_v7, 0.0  ;;  %v168_v10 = vsel %vm154_vm0, %v164_v8, 0.0 }
  0x35   : > { %v169_v11 = vadd.f32 %v168_v10, %v167_v9 }
  0x37   : > { %170 = vadd.xlane.f32.xlu0 %v169_v11 }
  0xa2   : > { %v159_v12 = vpop.xlane.xlu0 %158 }
  0xa6   : > { %175 = sbr.rel (%p243_p7) target bundleno = 174 (0xae), region = 32 }
  0xaa   : > { %v171_v13 = vpop.xlane.xlu0 %170 }
  0xab   : > { %vm176_vm1 = vcmask 3072  }
  0xac   : > { %177 = vst.msk [vmem:[%s485_s1] sm:$0xf] %vm176_vm1, %v159_v12 }
  0xad   : > { %178 = vst.msk [vmem:[%s486_s2] sm:$0xf] %vm176_vm1, %v171_v13 }
  0xae PF: > { %182 = sbr.rel (%p406_p5) target bundleno = 184 (0xb8), region = 36 }
  0xb3   : > { %v183_v14 = vld [vmem:[%s485_s1] sm:$0xf]  ;;  %vm185_vm2 = vcmask 3072  }
  0xb4   : > { %v187_v15 = vld [vmem:[%s486_s2] sm:$0xf]  ;;  %v184_v16 = vadd.f32 %v183_v14, %v159_v12 }
  0xb5   : > { %v188_v17 = vadd.f32 %v187_v15, %v171_v13 }
  0xb6   : > { %186 = vst.msk [vmem:[%s485_s1] sm:$0xf] %vm185_vm2, %v184_v16 }
  0xb7   : > { %189 = vst.msk [vmem:[%s486_s2] sm:$0xf] %vm185_vm2, %v188_v17 }
  0xb8 PF: > { %p13_p5 = scmp.ge.s32.totalorder %s388_s14, 4   ;;  %s491_s9 = smov %s343_s10 }
  0xb9   : > { %s492_s10 = smov %s347_s11  ;;  %s493_s11 = smov %s398_s17 }
  0xba   : > { %s494_s12 = smov %s388_s14  ;;  %15 = sbr.rel (!%p13_p5) target bundleno = 3 (0x3), region = 76 }
  0xbf   :  { %207 = vsyncpa [#allocation3], 1 }
  0xc0   :  { %209 = vsyncpa [#allocation3 + $0x1], 1 }

</bundles_post_ra>
